<compile_context>
chip_gen: v5e
topology: v5e:2x2
jax: 0.10.0
libtpu: 0.0.40
codegen_flags: <defaults>
</compile_context>

<pallas_src>
import jax
import jax.numpy as jnp
from jax.experimental import pallas as pl
from jax.experimental.pallas import tpu as pltpu

_MIB = 1024 * 1024


def _copy_kernel(x_ref, o_ref):
    # Pure copy: one VMEM tile load + one lane-dense store per grid step.
    o_ref[...] = x_ref[...]


def identity(x: jax.Array) -> jax.Array:
    """nn.Identity().forward(x) == x — zero-cost fast path (no kernel)."""
    return x


def _sublane_multiple(dtype) -> int:
    # Sub-32-bit dtypes pack along sublanes: f32 -> 8, bf16 -> 16, int8/fp8 -> 32.
    itemsize = jnp.dtype(dtype).itemsize
    return max(8, 32 // max(1, itemsize))


def _vmem_budget():
    """Returns (target_tile_bytes, vmem_limit_bytes), generation-conditional."""
    try:
        info = pltpu.get_tpu_info()
        cap = int(getattr(info, "vmem_capacity_bytes", 128 * _MIB))
    except Exception:
        cap = 128 * _MIB
    if cap <= 64 * _MIB:
        # v7x: 64 MiB physical VMEM. 4 live double-buffered tiles of 6 MiB = 24 MiB.
        return 6 * _MIB, 44 * _MIB
    # v5e / v6e: 128 MiB physical VMEM. 4 live tiles of 8 MiB = 32 MiB.
    return 8 * _MIB, 64 * _MIB


def identity_copy(x: jax.Array) -> jax.Array:
    """Identity that materializes a fresh buffer via a tiled Pallas copy kernel."""
    total = int(x.size)
    if total == 0:
        return x

    itemsize = jnp.dtype(x.dtype).itemsize
    sublane = _sublane_multiple(x.dtype)
    target_tile_bytes, vmem_limit_bytes = _vmem_budget()

    # ---- Build a lane-dense 2-D view, avoiding pad/slice whenever possible ----
    trailing_pad = 0
    if x.ndim >= 2 and x.shape[-1] % 128 == 0:
        # Fast path for typical NN shapes (..., D) with D a multiple of 128:
        # collapsing leading dims is a pure bitcast.
        lanes = int(x.shape[-1])
        x2d = x.reshape(total // lanes, lanes)
    else:
        flat = x.reshape(-1)
        lanes = None
        for cand in (1024, 512, 256, 128):
            if total % cand == 0:
                lanes = cand
                break
        if lanes is None:
            # Truly ragged total: pad only the tail to a multiple of 128 lanes
            # (<= 127 extra elements).
            # TODO(synk): a 1-D edge-masked BlockSpec could remove even this pad.
            lanes = 128
            padded = pl.cdiv(total, lanes) * lanes
            trailing_pad = padded - total
            flat = jnp.pad(flat, (0, trailing_pad))
        x2d = flat.reshape(flat.size // lanes, lanes)

    rows = int(x2d.shape[0])

    # ---- Block sizing: dtype-aware sublane multiple, ~target_tile_bytes per tile ----
    max_block_rows = max(
        sublane, (target_tile_bytes // (lanes * itemsize)) // sublane * sublane
    )
    # Keep >= ~4 grid steps when there is enough data (v7x megacore sharding).
    cap = pl.cdiv(pl.cdiv(rows, 4), sublane) * sublane
    block_rows = max(sublane, min(max_block_rows, cap))
    if block_rows >= rows:
        block_rows = rows  # single full-extent block (legal even if not sublane-multiple)

    grid = (pl.cdiv(rows, block_rows),)

    out2d = pl.pallas_call(
        _copy_kernel,
        out_shape=jax.ShapeDtypeStruct(x2d.shape, x2d.dtype),
        grid=grid,
        in_specs=[pl.BlockSpec((block_rows, lanes), lambda i: (i, 0))],
        out_specs=pl.BlockSpec((block_rows, lanes), lambda i: (i, 0)),
        compiler_params=pltpu.CompilerParams(
            # Parallel grid axis -> sharded across both TensorCores on v7x
            # (no effect on single-TC v5e/v6e).
            dimension_semantics=("parallel",),
            vmem_limit_bytes=vmem_limit_bytes,
        ),
    )(x2d)

    out = out2d
    if trailing_pad:
        out = out.reshape(-1)[:total]
    return out.reshape(x.shape)


if __name__ == "__main__":
    key = jax.random.PRNGKey(0)
    # Small NCHW input, same convention as the PyTorch module: (2, 4, 16, 16).
    x = jax.random.normal(key, (2, 4, 16, 16), dtype=jnp.float32)

    # Preferred path: true no-op identity.
    y = identity(x)
    jax.block_until_ready(y)
    assert y.shape == x.shape, f"shape mismatch: {y.shape} vs {x.shape}"
    assert y.dtype == x.dtype, f"dtype mismatch: {y.dtype} vs {x.dtype}"
    assert jnp.array_equal(y, x), "identity output differs from input"

    # Explicit-copy path: exercises the Pallas kernel (flatten path, lanes=1024).
    y_copy = identity_copy(x)
    jax.block_until_ready(y_copy)
    assert y_copy.shape == x.shape, f"shape mismatch: {y_copy.shape} vs {x.shape}"
    assert y_copy.dtype == x.dtype, f"dtype mismatch: {y_copy.dtype} vs {x.dtype}"
    assert jnp.array_equal(y_copy, x), "identity_copy output differs from input"

    # Fast 2-D path (trailing dim multiple of 128), bf16 sublane handling.
    x2 = jax.random.normal(key, (16, 256), dtype=jnp.bfloat16)
    y2 = identity_copy(x2)
    jax.block_until_ready(y2)
    assert jnp.array_equal(y2, x2), "identity_copy (2-D fast path) differs from input"

    # Ragged-total path (minimal tail pad + slice).
    x3 = jax.random.normal(key, (3, 5, 7), dtype=jnp.float32)
    y3 = identity_copy(x3)
    jax.block_until_ready(y3)
    assert jnp.array_equal(y3, x3), "identity_copy (ragged path) differs from input"

    print("KERNEL_OK")
</pallas_src>

<mosaic_0001>
module attributes {stable_mosaic.version = 11 : i64} {
  func.func @_copy_kernel(%arg0: i32, %arg1: memref<2x1024xf32, #tpu.memory_space<vmem>>, %arg2: memref<2x1024xf32, #tpu.memory_space<vmem>>) attributes {dimension_semantics = [#tpu.dimension_semantics<parallel>], iteration_bounds = array<i64: 1>, scalar_prefetch = 0 : i64, scratch_operands = 0 : i64, tpu.core_type = #tpu.core_type<tc>, window_params = [{transform_indices = @transform_0, window_bounds = array<i64: 2, 1024>}, {transform_indices = @transform_1, window_bounds = array<i64: 2, 1024>}]} {
    %c0 = arith.constant 0 : index
    %c0_0 = arith.constant 0 : index
    %0 = vector.load %arg1[%c0, %c0_0] : memref<2x1024xf32, #tpu.memory_space<vmem>>, vector<2x1024xf32>
    %c0_1 = arith.constant 0 : index
    %c0_2 = arith.constant 0 : index
    %1 = vector.load %arg2[%c0_1, %c0_2] : memref<2x1024xf32, #tpu.memory_space<vmem>>, vector<2x1024xf32>
    tpu.vector_store %arg2[%c0_1, %c0_2], %0 {strides = array<i32>} : memref<2x1024xf32, #tpu.memory_space<vmem>>, vector<2x1024xf32>,
    return
  }
  func.func @transform_0(%arg0: i32) -> (i32, i32) {
    %c0_i32 = arith.constant 0 : i32
    %c0_i32_0 = arith.constant 0 : i32
    return %arg0, %c0_i32 : i32, i32
  }
  func.func @transform_1(%arg0: i32) -> (i32, i32) {
    %c0_i32 = arith.constant 0 : i32
    %c0_i32_0 = arith.constant 0 : i32
    return %arg0, %c0_i32 : i32, i32
  }
}

</mosaic_0001>

<bundles_post_ra>
// kernel: tpu_custom_call.1
= control target key start
LH: loop header
LB: loop body
LE: loop exit
PB: predicated region body
PF: predicated region fallthrough
CT: control target
= control target key end

     0   :  { %6 = vsyncpa [#allocation3], 0  ;;  %s116_s0 = inlined_call_operand.hbm [shape: f32[2,1024], index: 0, kind: input, shape index: {}]   ;;  %s117_s1 = inlined_call_operand.hbm [shape: f32[2,1024], index: 1, kind: output, shape index: {}]  }
   0x1   :  { %7 = vsyncpa [#allocation4], 0  ;;  %s13_s8 = sshll.u32 %s116_s0, 4  ;;  %s98_s9 = smov [#allocation2]   ;;  %s14_s8 = int_to_ptr.hbm [resolvable:$true] %s13_s8 }
   0x2   :  { %s15_s10 = sshll.u32 %s98_s9, 4  ;;  %s16_s10 = int_to_ptr.vmem [resolvable:$true] %s15_s10 }
   0x3   :  { %18 = dma.hbm_to_vmem [thread:$0]  %s14_s8, 256, %s16_s10, [#allocation3]  }
   0x4   :  { %94 = dma.done.wait [#allocation3], 256  }
   0x5   :  { %95 = vsyncadd [#allocation3], 4294967040  ;;  %s99_s11 = smov [#allocation5]   ;;  %s34_s15 = sshll.u32 %s117_s1, 4  ;;  %v23_v0 = vld [vmem:[#allocation2] sm:$0xff]  ;;  %v24_v1 = vld [vmem:[#allocation2 + $0x8] sm:$0xff]  ;;  %s35_s15 = int_to_ptr.hbm [resolvable:$true] %s34_s15 }
   0x6   :  { %s32_s12 = sshll.u32 %s99_s11, 4  ;;  %25 = vst [vmem:[#allocation5] sm:$0xff] %v23_v0  ;;  %s33_s12 = int_to_ptr.vmem [resolvable:$true] %s32_s12 }
   0x7   :  { %26 = vst [vmem:[#allocation5 + $0x8] sm:$0xff] %v24_v1 }
   0x8   :  { %37 = dma.vmem_to_hbm [thread:$0]  %s33_s12, 256, %s35_s15, [#allocation4]  }
   0x9   :  { %96 = dma.done.wait [#allocation4], 256  }
   0xa   :  { %97 = vsyncadd [#allocation4], 4294967040 }
   0xb   :  { %42 = vsyncpa [#allocation3], 1 }
   0xc   :  { %43 = vsyncpa [#allocation4], 1 }

</bundles_post_ra>
